<compile_context>
chip_gen: v7x
topology: tpu7x:2x2x1
jax: 0.10.0
libtpu: 0.0.40
codegen_flags: <defaults>
</compile_context>

<pallas_src>
import jax
import jax.numpy as jnp
from jax.experimental import pallas as pl
from jax.experimental.pallas import tpu as pltpu

_LANE = 128


def _spectral_mix_kernel(xr_ref, xi_ref, wr_ref, wi_ref, or_ref, oi_ref):
    """Complex channel mixing for one block of Fourier modes.

    xr/xi : (B, Cin,  bm)   real / imag planes of x_ft modes
    wr/wi : (Cin, Cout, bm) real / imag planes of the weights
    or/oi : (B, Cout, bm)
    out[b, o, m] = sum_i x[b, i, m] * w[i, o, m]   (complex product)
    """
    B, Cin, bm = xr_ref.shape
    Cout = wr_ref.shape[1]

    xr = xr_ref[...]
    xi = xi_ref[...]
    wr = wr_ref[...]
    wi = wi_ref[...]

    acc_r = jnp.zeros((B, Cout, bm), jnp.float32)
    acc_i = jnp.zeros((B, Cout, bm), jnp.float32)
    # Static unroll over the small input-channel dim: pure VPU multiply-accumulate on
    # lane-dense (B, Cout, bm) tiles (f32 everywhere -> also valid on v5e's VPU).
    for i in range(Cin):
        xr_i = xr[:, i:i + 1, :]          # (B, 1,   bm)
        xi_i = xi[:, i:i + 1, :]
        wr_i = wr[i:i + 1, :, :]          # (1, Cout, bm)
        wi_i = wi[i:i + 1, :, :]
        acc_r = acc_r + xr_i * wr_i - xi_i * wi_i
        acc_i = acc_i + xr_i * wi_i + xi_i * wr_i

    # Single full-tile, lane-dense stores.
    or_ref[...] = acc_r
    oi_ref[...] = acc_i


def _mode_block_size(B, Cin, Cout, m_total):
    """Largest mode-block (multiple of 128) with a small double-buffered working set."""
    per_mode_bytes = 4 * 2 * (B * Cin + Cin * Cout + B * Cout)   # f32, real+imag, x+w+out
    budget = 4 * 1024 * 1024                                      # per single-buffered set
    cap = max(_LANE, (budget // per_mode_bytes) // _LANE * _LANE)
    return min(pl.cdiv(m_total, _LANE) * _LANE, cap)


def _spectral_channel_mix(xr, xi, wr, wi):
    """out[b,o,m] = sum_i x[b,i,m] * w[i,o,m] (complex), real/imag planes via Pallas.

    xr, xi : (B, Cin,  M) float32
    wr, wi : (Cin, Cout, M) float32
    returns (out_r, out_i), each (B, Cout, M) float32
    """
    B, Cin, M = xr.shape
    Cout = wr.shape[1]

    bm = _mode_block_size(B, Cin, Cout, M)
    m_pad = pl.cdiv(M, bm) * bm
    if m_pad != M:                       # zero-pad mode axis -> unmasked 128-lane tiles
        pad = ((0, 0), (0, 0), (0, m_pad - M))
        xr = jnp.pad(xr, pad)
        xi = jnp.pad(xi, pad)
        wr = jnp.pad(wr, pad)
        wi = jnp.pad(wi, pad)
    grid_m = m_pad // bm

    x_spec = pl.BlockSpec((B, Cin, bm), lambda m: (0, 0, m))
    w_spec = pl.BlockSpec((Cin, Cout, bm), lambda m: (0, 0, m))
    o_spec = pl.BlockSpec((B, Cout, bm), lambda m: (0, 0, m))

    out_r, out_i = pl.pallas_call(
        _spectral_mix_kernel,
        out_shape=(
            jax.ShapeDtypeStruct((B, Cout, m_pad), jnp.float32),
            jax.ShapeDtypeStruct((B, Cout, m_pad), jnp.float32),
        ),
        grid=(grid_m,),
        in_specs=[x_spec, x_spec, w_spec, w_spec],
        out_specs=(o_spec, o_spec),
        compiler_params=pltpu.CompilerParams(
            dimension_semantics=("parallel",),      # independent mode blocks (megacore OK)
            vmem_limit_bytes=32 * 1024 * 1024,
        ),
    )(xr, xi, wr, wi)

    return out_r[:, :, :M], out_i[:, :, :M]


def spectral_conv2d_fast(x, weights1, weights2, modes1, modes2):
    """Forward pass of SpectralConv2d_fast.

    x        : (B, Cin, H, W) float32, NCHW
    weights1 : (Cin, Cout, modes1, modes2, 2) float32  (real/imag in last dim)
    weights2 : (Cin, Cout, modes1, modes2, 2) float32
    returns  : (B, Cout, H, W) float32
    """
    B, Cin, H, W = x.shape
    Cout = weights1.shape[1]
    Wf = W // 2 + 1
    M = modes1 * modes2
    assert 2 * modes1 <= H, "low/high frequency corners would overlap"
    assert modes2 <= Wf

    # FFT stays in plain JAX.  # TODO(synk): rfft2/irfft2 have no Pallas equivalent.
    x_ft = jnp.fft.rfft2(x)                                  # (B, Cin, H, Wf) complex64

    # Both frequency corners, flattened and concatenated along the trailing mode axis
    # (no transposes: mode dims are already trailing).
    lo = x_ft[:, :, :modes1, :modes2].reshape(B, Cin, M)
    hi = x_ft[:, :, H - modes1:, :modes2].reshape(B, Cin, M)
    x_modes = jnp.concatenate([lo, hi], axis=-1)             # (B, Cin, 2M) complex64
    xr = jnp.real(x_modes)
    xi = jnp.imag(x_modes)

    # Weights go in as raw real/imag planes (no complex64 assembly / re-splitting).
    wr = jnp.concatenate(
        [weights1[..., 0].reshape(Cin, Cout, M),
         weights2[..., 0].reshape(Cin, Cout, M)], axis=-1)   # (Cin, Cout, 2M)
    wi = jnp.concatenate(
        [weights1[..., 1].reshape(Cin, Cout, M),
         weights2[..., 1].reshape(Cin, Cout, M)], axis=-1)

    out_r, out_i = _spectral_channel_mix(xr, xi, wr, wi)     # (B, Cout, 2M) each

    out_c = jax.lax.complex(out_r, out_i)                    # single complex assembly
    out_lo = out_c[:, :, :M].reshape(B, Cout, modes1, modes2)
    out_hi = out_c[:, :, M:].reshape(B, Cout, modes1, modes2)

    out_ft = jnp.zeros((B, Cout, H, Wf), dtype=jnp.complex64)
    out_ft = out_ft.at[:, :, :modes1, :modes2].set(out_lo)
    out_ft = out_ft.at[:, :, H - modes1:, :modes2].set(out_hi)

    return jnp.fft.irfft2(out_ft, s=(H, W))                  # (B, Cout, H, W) float32


def _reference(x, weights1, weights2, modes1, modes2):
    # Pure-JAX reference mirroring the PyTorch forward exactly.
    B, Cin, H, W = x.shape
    Cout = weights1.shape[1]
    Wf = W // 2 + 1
    x_ft = jnp.fft.rfft2(x)
    w1c = weights1[..., 0] + 1j * weights1[..., 1]
    w2c = weights2[..., 0] + 1j * weights2[..., 1]
    out_ft = jnp.zeros((B, Cout, H, Wf), dtype=jnp.complex64)
    out_ft = out_ft.at[:, :, :modes1, :modes2].set(
        jnp.einsum('bixy,ioxy->boxy', x_ft[:, :, :modes1, :modes2], w1c))
    out_ft = out_ft.at[:, :, H - modes1:, :modes2].set(
        jnp.einsum('bixy,ioxy->boxy', x_ft[:, :, H - modes1:, :modes2], w2c))
    return jnp.fft.irfft2(out_ft, s=(H, W))


if __name__ == "__main__":
    B, Cin, Cout, H, W = 2, 4, 4, 16, 16
    modes1, modes2 = 4, 4

    key = jax.random.PRNGKey(0)
    kx, k1, k2 = jax.random.split(key, 3)

    x = jax.random.normal(kx, (B, Cin, H, W), dtype=jnp.float32)

    # Deterministic init matching the module: scale * U[0,1), shape (Cin,Cout,m1,m2,2)
    scale = 1.0 / (Cin * Cout)
    weights1 = scale * jax.random.uniform(k1, (Cin, Cout, modes1, modes2, 2), dtype=jnp.float32)
    weights2 = scale * jax.random.uniform(k2, (Cin, Cout, modes1, modes2, 2), dtype=jnp.float32)

    fn = jax.jit(lambda x, w1, w2: spectral_conv2d_fast(x, w1, w2, modes1, modes2))
    out = jax.block_until_ready(fn(x, weights1, weights2))

    ref = _reference(x, weights1, weights2, modes1, modes2)
    assert out.shape == (B, Cout, H, W)
    assert jnp.allclose(out, ref, atol=1e-5, rtol=1e-5)

    print("KERNEL_OK")
</pallas_src>

<mosaic_0001>
module attributes {stable_mosaic.version = 11 : i64} {
  func.func @_spectral_mix_kernel(%arg0: i32, %arg1: memref<2x4x128xf32, #tpu.memory_space<vmem>>, %arg2: memref<2x4x128xf32, #tpu.memory_space<vmem>>, %arg3: memref<4x4x128xf32, #tpu.memory_space<vmem>>, %arg4: memref<4x4x128xf32, #tpu.memory_space<vmem>>, %arg5: memref<2x4x128xf32, #tpu.memory_space<vmem>>, %arg6: memref<2x4x128xf32, #tpu.memory_space<vmem>>) attributes {dimension_semantics = [#tpu.dimension_semantics<parallel>], iteration_bounds = array<i64: 1>, scalar_prefetch = 0 : i64, scratch_operands = 0 : i64, tpu.core_type = #tpu.core_type<tc>, window_params = [{transform_indices = @transform_0, window_bounds = array<i64: 2, 4, 128>}, {transform_indices = @transform_1, window_bounds = array<i64: 2, 4, 128>}, {transform_indices = @transform_2, window_bounds = array<i64: 4, 4, 128>}, {transform_indices = @transform_3, window_bounds = array<i64: 4, 4, 128>}, {transform_indices = @transform_4, window_bounds = array<i64: 2, 4, 128>}, {transform_indices = @transform_5, window_bounds = array<i64: 2, 4, 128>}]} {
    %c0 = arith.constant 0 : index
    %c0_0 = arith.constant 0 : index
    %c0_1 = arith.constant 0 : index
    %0 = vector.load %arg1[%c0, %c0_0, %c0_1] : memref<2x4x128xf32, #tpu.memory_space<vmem>>, vector<2x4x128xf32>
    %c0_2 = arith.constant 0 : index
    %c0_3 = arith.constant 0 : index
    %c0_4 = arith.constant 0 : index
    %1 = vector.load %arg2[%c0_2, %c0_3, %c0_4] : memref<2x4x128xf32, #tpu.memory_space<vmem>>, vector<2x4x128xf32>
    %c0_5 = arith.constant 0 : index
    %c0_6 = arith.constant 0 : index
    %c0_7 = arith.constant 0 : index
    %2 = vector.load %arg3[%c0_5, %c0_6, %c0_7] : memref<4x4x128xf32, #tpu.memory_space<vmem>>, vector<4x4x128xf32>
    %c0_8 = arith.constant 0 : index
    %c0_9 = arith.constant 0 : index
    %c0_10 = arith.constant 0 : index
    %3 = vector.load %arg4[%c0_8, %c0_9, %c0_10] : memref<4x4x128xf32, #tpu.memory_space<vmem>>, vector<4x4x128xf32>
    %cst = arith.constant 0.000000e+00 : f32
    %4 = vector.broadcast %cst : f32 to vector<2x4x128xf32>
    %cst_11 = arith.constant 0.000000e+00 : f32
    %5 = vector.broadcast %cst_11 : f32 to vector<2x4x128xf32>
    %6 = vector.extract_strided_slice %0 {offsets = [0, 0, 0], sizes = [2, 1, 128], strides = [1, 1, 1]} : vector<2x4x128xf32> to vector<2x1x128xf32>
    %7 = vector.extract_strided_slice %1 {offsets = [0, 0, 0], sizes = [2, 1, 128], strides = [1, 1, 1]} : vector<2x4x128xf32> to vector<2x1x128xf32>
    %8 = vector.extract_strided_slice %2 {offsets = [0, 0, 0], sizes = [1, 4, 128], strides = [1, 1, 1]} : vector<4x4x128xf32> to vector<1x4x128xf32>
    %9 = vector.extract_strided_slice %3 {offsets = [0, 0, 0], sizes = [1, 4, 128], strides = [1, 1, 1]} : vector<4x4x128xf32> to vector<1x4x128xf32>
    %10 = vector.broadcast %6 : vector<2x1x128xf32> to vector<2x4x128xf32>
    %11 = vector.broadcast %8 : vector<1x4x128xf32> to vector<2x4x128xf32>
    %12 = arith.mulf %10, %11 : vector<2x4x128xf32>
    %13 = arith.addf %4, %12 : vector<2x4x128xf32>
    %14 = vector.broadcast %7 : vector<2x1x128xf32> to vector<2x4x128xf32>
    %15 = vector.broadcast %9 : vector<1x4x128xf32> to vector<2x4x128xf32>
    %16 = arith.mulf %14, %15 : vector<2x4x128xf32>
    %17 = arith.subf %13, %16 : vector<2x4x128xf32>
    %18 = vector.broadcast %6 : vector<2x1x128xf32> to vector<2x4x128xf32>
    %19 = vector.broadcast %9 : vector<1x4x128xf32> to vector<2x4x128xf32>
    %20 = arith.mulf %18, %19 : vector<2x4x128xf32>
    %21 = arith.addf %5, %20 : vector<2x4x128xf32>
    %22 = vector.broadcast %7 : vector<2x1x128xf32> to vector<2x4x128xf32>
    %23 = vector.broadcast %8 : vector<1x4x128xf32> to vector<2x4x128xf32>
    %24 = arith.mulf %22, %23 : vector<2x4x128xf32>
    %25 = arith.addf %21, %24 : vector<2x4x128xf32>
    %26 = vector.extract_strided_slice %0 {offsets = [0, 1, 0], sizes = [2, 1, 128], strides = [1, 1, 1]} : vector<2x4x128xf32> to vector<2x1x128xf32>
    %27 = vector.extract_strided_slice %1 {offsets = [0, 1, 0], sizes = [2, 1, 128], strides = [1, 1, 1]} : vector<2x4x128xf32> to vector<2x1x128xf32>
    %28 = vector.extract_strided_slice %2 {offsets = [1, 0, 0], sizes = [1, 4, 128], strides = [1, 1, 1]} : vector<4x4x128xf32> to vector<1x4x128xf32>
    %29 = vector.extract_strided_slice %3 {offsets = [1, 0, 0], sizes = [1, 4, 128], strides = [1, 1, 1]} : vector<4x4x128xf32> to vector<1x4x128xf32>
    %30 = vector.broadcast %26 : vector<2x1x128xf32> to vector<2x4x128xf32>
    %31 = vector.broadcast %28 : vector<1x4x128xf32> to vector<2x4x128xf32>
    %32 = arith.mulf %30, %31 : vector<2x4x128xf32>
    %33 = arith.addf %17, %32 : vector<2x4x128xf32>
    %34 = vector.broadcast %27 : vector<2x1x128xf32> to vector<2x4x128xf32>
    %35 = vector.broadcast %29 : vector<1x4x128xf32> to vector<2x4x128xf32>
    %36 = arith.mulf %34, %35 : vector<2x4x128xf32>
    %37 = arith.subf %33, %36 : vector<2x4x128xf32>
    %38 = vector.broadcast %26 : vector<2x1x128xf32> to vector<2x4x128xf32>
    %39 = vector.broadcast %29 : vector<1x4x128xf32> to vector<2x4x128xf32>
    %40 = arith.mulf %38, %39 : vector<2x4x128xf32>
    %41 = arith.addf %25, %40 : vector<2x4x128xf32>
    %42 = vector.broadcast %27 : vector<2x1x128xf32> to vector<2x4x128xf32>
    %43 = vector.broadcast %28 : vector<1x4x128xf32> to vector<2x4x128xf32>
    %44 = arith.mulf %42, %43 : vector<2x4x128xf32>
    %45 = arith.addf %41, %44 : vector<2x4x128xf32>
    %46 = vector.extract_strided_slice %0 {offsets = [0, 2, 0], sizes = [2, 1, 128], strides = [1, 1, 1]} : vector<2x4x128xf32> to vector<2x1x128xf32>
    %47 = vector.extract_strided_slice %1 {offsets = [0, 2, 0], sizes = [2, 1, 128], strides = [1, 1, 1]} : vector<2x4x128xf32> to vector<2x1x128xf32>
    %48 = vector.extract_strided_slice %2 {offsets = [2, 0, 0], sizes = [1, 4, 128], strides = [1, 1, 1]} : vector<4x4x128xf32> to vector<1x4x128xf32>
    %49 = vector.extract_strided_slice %3 {offsets = [2, 0, 0], sizes = [1, 4, 128], strides = [1, 1, 1]} : vector<4x4x128xf32> to vector<1x4x128xf32>
    %50 = vector.broadcast %46 : vector<2x1x128xf32> to vector<2x4x128xf32>
    %51 = vector.broadcast %48 : vector<1x4x128xf32> to vector<2x4x128xf32>
    %52 = arith.mulf %50, %51 : vector<2x4x128xf32>
    %53 = arith.addf %37, %52 : vector<2x4x128xf32>
    %54 = vector.broadcast %47 : vector<2x1x128xf32> to vector<2x4x128xf32>
    %55 = vector.broadcast %49 : vector<1x4x128xf32> to vector<2x4x128xf32>
    %56 = arith.mulf %54, %55 : vector<2x4x128xf32>
    %57 = arith.subf %53, %56 : vector<2x4x128xf32>
    %58 = vector.broadcast %46 : vector<2x1x128xf32> to vector<2x4x128xf32>
    %59 = vector.broadcast %49 : vector<1x4x128xf32> to vector<2x4x128xf32>
    %60 = arith.mulf %58, %59 : vector<2x4x128xf32>
    %61 = arith.addf %45, %60 : vector<2x4x128xf32>
    %62 = vector.broadcast %47 : vector<2x1x128xf32> to vector<2x4x128xf32>
    %63 = vector.broadcast %48 : vector<1x4x128xf32> to vector<2x4x128xf32>
    %64 = arith.mulf %62, %63 : vector<2x4x128xf32>
    %65 = arith.addf %61, %64 : vector<2x4x128xf32>
    %66 = vector.extract_strided_slice %0 {offsets = [0, 3, 0], sizes = [2, 1, 128], strides = [1, 1, 1]} : vector<2x4x128xf32> to vector<2x1x128xf32>
    %67 = vector.extract_strided_slice %1 {offsets = [0, 3, 0], sizes = [2, 1, 128], strides = [1, 1, 1]} : vector<2x4x128xf32> to vector<2x1x128xf32>
    %68 = vector.extract_strided_slice %2 {offsets = [3, 0, 0], sizes = [1, 4, 128], strides = [1, 1, 1]} : vector<4x4x128xf32> to vector<1x4x128xf32>
    %69 = vector.extract_strided_slice %3 {offsets = [3, 0, 0], sizes = [1, 4, 128], strides = [1, 1, 1]} : vector<4x4x128xf32> to vector<1x4x128xf32>
    %70 = vector.broadcast %66 : vector<2x1x128xf32> to vector<2x4x128xf32>
    %71 = vector.broadcast %68 : vector<1x4x128xf32> to vector<2x4x128xf32>
    %72 = arith.mulf %70, %71 : vector<2x4x128xf32>
    %73 = arith.addf %57, %72 : vector<2x4x128xf32>
    %74 = vector.broadcast %67 : vector<2x1x128xf32> to vector<2x4x128xf32>
    %75 = vector.broadcast %69 : vector<1x4x128xf32> to vector<2x4x128xf32>
    %76 = arith.mulf %74, %75 : vector<2x4x128xf32>
    %77 = arith.subf %73, %76 : vector<2x4x128xf32>
    %78 = vector.broadcast %66 : vector<2x1x128xf32> to vector<2x4x128xf32>
    %79 = vector.broadcast %69 : vector<1x4x128xf32> to vector<2x4x128xf32>
    %80 = arith.mulf %78, %79 : vector<2x4x128xf32>
    %81 = arith.addf %65, %80 : vector<2x4x128xf32>
    %82 = vector.broadcast %67 : vector<2x1x128xf32> to vector<2x4x128xf32>
    %83 = vector.broadcast %68 : vector<1x4x128xf32> to vector<2x4x128xf32>
    %84 = arith.mulf %82, %83 : vector<2x4x128xf32>
    %85 = arith.addf %81, %84 : vector<2x4x128xf32>
    %c0_12 = arith.constant 0 : index
    %c0_13 = arith.constant 0 : index
    %c0_14 = arith.constant 0 : index
    %86 = vector.load %arg5[%c0_12, %c0_13, %c0_14] : memref<2x4x128xf32, #tpu.memory_space<vmem>>, vector<2x4x128xf32>
    tpu.vector_store %arg5[%c0_12, %c0_13, %c0_14], %77 {strides = array<i32>} : memref<2x4x128xf32, #tpu.memory_space<vmem>>, vector<2x4x128xf32>,
    %c0_15 = arith.constant 0 : index
    %c0_16 = arith.constant 0 : index
    %c0_17 = arith.constant 0 : index
    %87 = vector.load %arg6[%c0_15, %c0_16, %c0_17] : memref<2x4x128xf32, #tpu.memory_space<vmem>>, vector<2x4x128xf32>
    tpu.vector_store %arg6[%c0_15, %c0_16, %c0_17], %85 {strides = array<i32>} : memref<2x4x128xf32, #tpu.memory_space<vmem>>, vector<2x4x128xf32>,
    return
  }
  func.func @transform_0(%arg0: i32) -> (i32, i32, i32) {
    %c0_i32 = arith.constant 0 : i32
    %c0_i32_0 = arith.constant 0 : i32
    %c0_i32_1 = arith.constant 0 : i32
    return %c0_i32, %c0_i32_0, %arg0 : i32, i32, i32
  }
  func.func @transform_1(%arg0: i32) -> (i32, i32, i32) {
    %c0_i32 = arith.constant 0 : i32
    %c0_i32_0 = arith.constant 0 : i32
    %c0_i32_1 = arith.constant 0 : i32
    return %c0_i32, %c0_i32_0, %arg0 : i32, i32, i32
  }
  func.func @transform_2(%arg0: i32) -> (i32, i32, i32) {
    %c0_i32 = arith.constant 0 : i32
    %c0_i32_0 = arith.constant 0 : i32
    %c0_i32_1 = arith.constant 0 : i32
    return %c0_i32, %c0_i32_0, %arg0 : i32, i32, i32
  }
  func.func @transform_3(%arg0: i32) -> (i32, i32, i32) {
    %c0_i32 = arith.constant 0 : i32
    %c0_i32_0 = arith.constant 0 : i32
    %c0_i32_1 = arith.constant 0 : i32
    return %c0_i32, %c0_i32_0, %arg0 : i32, i32, i32
  }
  func.func @transform_4(%arg0: i32) -> (i32, i32, i32) {
    %c0_i32 = arith.constant 0 : i32
    %c0_i32_0 = arith.constant 0 : i32
    %c0_i32_1 = arith.constant 0 : i32
    return %c0_i32, %c0_i32_0, %arg0 : i32, i32, i32
  }
  func.func @transform_5(%arg0: i32) -> (i32, i32, i32) {
    %c0_i32 = arith.constant 0 : i32
    %c0_i32_0 = arith.constant 0 : i32
    %c0_i32_1 = arith.constant 0 : i32
    return %c0_i32, %c0_i32_0, %arg0 : i32, i32, i32
  }
}

</mosaic_0001>

<bundles_post_ra>
// kernel: squeeze.7
= control target key start
LH: loop header
LB: loop body
LE: loop exit
PB: predicated region body
PF: predicated region fallthrough
CT: control target
= control target key end

     0   :  { %vm82_vm0 = vcmask 1047556   ;;  %vm84_vm1 = vcmask 31744   ;;  %s235_s9 = smov 12   ;;  %s236_s10 = smov 4   ;;  %vm107_vm2 = vcmask 130144   ;;  %vm132_vm3 = vcmask 97344   ;;  %s319_s0 = inlined_call_operand.vmem [shape: f32[4,4,4,4], index: 0, kind: input, shape index: {}]   ;;  %s320_s1 = inlined_call_operand.vmem [shape: f32[4,4,16], index: 1, kind: output, shape index: {}]  }
   0x1   :  { %v221_v0 = vld [vmem:[%s319_s0 + $0x1c] sm:$0xf]  ;;  %v222_v1 = vld [vmem:[%s319_s0 + $0x18] sm:$0xf]  ;;  %v223_v2 = vld [vmem:[%s319_s0 + $0x14] sm:$0xf] }
   0x2   :  { %48 = vst [vmem:[#allocation1 + $0x38] sm:$0xf] %v221_v0  ;;  %53 = vst [vmem:[#allocation1 + $0x30] sm:$0xf] %v222_v1  ;;  %v224_v3 = vld [vmem:[%s319_s0 + $0x10] sm:$0xf] }
   0x3   :  { %58 = vst [vmem:[#allocation1 + $0x28] sm:$0xf] %v223_v2  ;;  %v225_v4 = vld [vmem:[%s319_s0 + $0xc] sm:$0xf]  ;;  %v226_v5 = vld [vmem:[%s319_s0 + $0x8] sm:$0xf] }
   0x4   :  { %63 = vst [vmem:[#allocation1 + $0x20] sm:$0xf] %v224_v3  ;;  %68 = vst [vmem:[#allocation1 + $0x18] sm:$0xf] %v225_v4  ;;  %v227_v6 = vld [vmem:[%s319_s0 + $0x4] sm:$0xf] }
   0x5   :  { %73 = vst [vmem:[#allocation1 + $0x10] sm:$0xf] %v226_v5  ;;  %v78_v7 = vld [vmem:[%s319_s0] sm:$0xf]  ;;  %77 = vst [vmem:[#allocation1 + $0x8] sm:$0xf] %v227_v6 }
   0x6   :  { %79 = vst [vmem:[#allocation1] sm:$0xf] %v78_v7  ;;  %v213_v8 = vld [vmem:[%s319_s0 + $0x3c] sm:$0xf]  ;;  %v214_v9 = vld [vmem:[%s319_s0 + $0x38] sm:$0xf] }
   0x7   :  { %8 = vst [vmem:[#allocation1 + $0x78] sm:$0xf] %v213_v8  ;;  %13 = vst [vmem:[#allocation1 + $0x70] sm:$0xf] %v214_v9  ;;  %v215_v10 = vld [vmem:[%s319_s0 + $0x34] sm:$0xf] }
   0x8   :  { %v216_v11 = vld [vmem:[%s319_s0 + $0x30] sm:$0xf]  ;;  %v217_v12 = vld [vmem:[%s319_s0 + $0x2c] sm:$0xf]  ;;  %18 = vst [vmem:[#allocation1 + $0x68] sm:$0xf] %v215_v10 }
   0x9   :  { %23 = vst [vmem:[#allocation1 + $0x60] sm:$0xf] %v216_v11  ;;  %28 = vst [vmem:[#allocation1 + $0x58] sm:$0xf] %v217_v12  ;;  %v218_v13 = vld [vmem:[%s319_s0 + $0x28] sm:$0xf] }
   0xa   :  { %v219_v14 = vld [vmem:[%s319_s0 + $0x24] sm:$0xf]  ;;  %v220_v15 = vld [vmem:[%s319_s0 + $0x20] sm:$0xf]  ;;  %33 = vst [vmem:[#allocation1 + $0x50] sm:$0xf] %v218_v13 }
   0xb   :  { %38 = vst [vmem:[#allocation1 + $0x48] sm:$0xf] %v219_v14  ;;  %43 = vst [vmem:[#allocation1 + $0x40] sm:$0xf] %v220_v15  ;;  %s234_s0 = smov 8   ;;  %vm157_vm4 = vcmask 64544  }
   0xc   :  { %v127_v16 = vld [vmem:[#allocation1 + $0x2] ss:$8 sm:$0xf0]   ;;  %v102_v17 = vld [vmem:[#allocation1 + $0x3] ss:$8 sm:$0xf0]  }
   0xd   :  { %v125_v18 = vld [vmem:[#allocation1 + $0x2] ss:$8 sm:$0xf]   ;;  %v100_v19 = vld [vmem:[#allocation1 + $0x3] ss:$8 sm:$0xf]  }
   0xe   :  { %v129_v20 = vsel %vm82_vm0, %v127_v16, %v125_v18  ;;  %v104_v21 = vsel %vm82_vm0, %v102_v17, %v100_v19  ;;  %v150_v24 = vld [vmem:[#allocation1 + $0x1] ss:$8 sm:$0xf]   ;;  %v80_v32 = vld [vmem:[#allocation1] ss:$8 sm:$0xf]  }
   0xf   :  { %130 = vrot.lane.b32.xlu1 %v129_v20, %s234_s0  ;;  %105 = vrot.lane.b32.xlu0 %v104_v21, %s235_s9  ;;  %v152_v25 = vld [vmem:[#allocation1 + $0x1] ss:$8 sm:$0xf0]   ;;  %v81_v33 = vld [vmem:[#allocation1] ss:$8 sm:$0xf0]  }
  0x10   :  { %v139_v22 = vld [vmem:[#allocation1 + $0x42] ss:$8 sm:$0xf0]   ;;  %v114_v23 = vld [vmem:[#allocation1 + $0x43] ss:$8 sm:$0xf0]   ;;  %v83_v34 = vsel %vm82_vm0, %v81_v33, %v80_v32  ;;  %v154_v38 = vsel %vm82_vm0, %v152_v25, %v150_v24 }
  0x11   :  { %v164_v31 = vld [vmem:[#allocation1 + $0x41] ss:$8 sm:$0xf0]   ;;  %v91_v36 = vld [vmem:[#allocation1 + $0x40] ss:$8 sm:$0xf0]  }
  0x12   :  { %v137_v26 = vld [vmem:[#allocation1 + $0x42] ss:$8 sm:$0xf]   ;;  %v112_v27 = vld [vmem:[#allocation1 + $0x43] ss:$8 sm:$0xf]  }
  0x13   :  { %v141_v28 = vsel %vm82_vm0, %v139_v22, %v137_v26  ;;  %v116_v29 = vsel %vm82_vm0, %v114_v23, %v112_v27  ;;  %v162_v30 = vld [vmem:[#allocation1 + $0x41] ss:$8 sm:$0xf]   ;;  %v89_v35 = vld [vmem:[#allocation1 + $0x40] ss:$8 sm:$0xf]  }
  0x14   :  { %142 = vrot.lane.b32.xlu1 %v141_v28, %s234_s0  ;;  %117 = vrot.lane.b32.xlu0 %v116_v29, %s235_s9  ;;  %v166_v37 = vsel %vm82_vm0, %v164_v31, %v162_v30  ;;  %85 = vst.msk [vmem:[#allocation0] sm:$0xf] %vm84_vm1, %v83_v34   ;;  %87 = vst.msk [vmem:[#allocation0 + $0x4] sm:$0xf0] %vm84_vm1, %v83_v34   ;;  %v93_v39 = vsel %vm82_vm0, %v91_v36, %v89_v35 }
  0x15   :  { %96 = vst.msk [vmem:[#allocation0 + $0x10] sm:$0xf] %vm84_vm1, %v93_v39   ;;  %98 = vst.msk [vmem:[#allocation0 + $0x14] sm:$0xf0] %vm84_vm1, %v93_v39  }
  0x18   :  { %167 = vrot.lane.b32.xlu1 %v166_v37, %s236_s10  ;;  %155 = vrot.lane.b32.xlu0 %v154_v38, %s236_s10 }
  0x81   :  { %v131_v40 = vpop.permute.xlu1 %130   ;;  %v106_v41 = vpop.permute.xlu0 %105  }
  0x82   :  { %108 = vst.msk [vmem:[#allocation0] sm:$0xf] %vm107_vm2, %v106_v41   ;;  %110 = vst.msk [vmem:[#allocation0 + $0x4] sm:$0xf0] %vm107_vm2, %v106_v41  }
  0x83   :  { %133 = vst.msk [vmem:[#allocation0] sm:$0xf] %vm132_vm3, %v131_v40   ;;  %135 = vst.msk [vmem:[#allocation0 + $0x4] sm:$0xf0] %vm132_vm3, %v131_v40  }
  0x86   :  { %v143_v42 = vpop.permute.xlu1 %142   ;;  %v118_v43 = vpop.permute.xlu0 %117  }
  0x87   :  { %121 = vst.msk [vmem:[#allocation0 + $0x10] sm:$0xf] %vm107_vm2, %v118_v43   ;;  %123 = vst.msk [vmem:[#allocation0 + $0x14] sm:$0xf0] %vm107_vm2, %v118_v43  }
  0x88   :  { %146 = vst.msk [vmem:[#allocation0 + $0x10] sm:$0xf] %vm132_vm3, %v143_v42   ;;  %148 = vst.msk [vmem:[#allocation0 + $0x14] sm:$0xf0] %vm132_vm3, %v143_v42  }
  0x8a   :  { %v168_v44 = vpop.permute.xlu1 %167   ;;  %v156_v45 = vpop.permute.xlu0 %155  }
  0x8b   :  { %171 = vst.msk [vmem:[#allocation0 + $0x10] sm:$0xf] %vm157_vm4, %v168_v44   ;;  %173 = vst.msk [vmem:[#allocation0 + $0x14] sm:$0xf0] %vm157_vm4, %v168_v44  }
  0x8c   :  { %158 = vst.msk [vmem:[#allocation0] sm:$0xf] %vm157_vm4, %v156_v45   ;;  %160 = vst.msk [vmem:[#allocation0 + $0x4] sm:$0xf0] %vm157_vm4, %v156_v45  }
  0x92   :  { %v186_v46 = vld [vmem:[#allocation0 + $0x10] sm:$0xf]  ;;  %v192_v47 = vld [vmem:[#allocation0 + $0x18] sm:$0xf] }
  0x93   :  { %v177_v48 = vld [vmem:[#allocation0] sm:$0xf]  ;;  %229 = vst [vmem:[%s320_s1 + $0x8] sm:$0xf] %v186_v46  ;;  %230 = vst [vmem:[%s320_s1 + $0xc] sm:$0xf] %v192_v47 }
  0x94   :  { %179 = vst [vmem:[%s320_s1] sm:$0xf] %v177_v48  ;;  %v181_v49 = vld [vmem:[#allocation0 + $0x8] sm:$0xf] }
  0x95   :  { %228 = vst [vmem:[%s320_s1 + $0x4] sm:$0xf] %v181_v49 }

// kernel: _lambda_.1
= control target key start
LH: loop header
LB: loop body
LE: loop exit
PB: predicated region body
PF: predicated region fallthrough
CT: control target
= control target key end

     0   :  { %v31_v0 = vlaneseq  ;;  %s261_s0 = inlined_call_operand.vmem [shape: f32[2,4,128], index: 0, kind: input, shape index: {}]   ;;  %s262_s1 = inlined_call_operand.vmem [shape: f32[2,4,128], index: 1, kind: input, shape index: {}]   ;;  %s263_s2 = inlined_call_operand.vmem [shape: f32[4,4,128], index: 2, kind: input, shape index: {}]   ;;  %s264_s3 = inlined_call_operand.vmem [shape: f32[4,4,128], index: 3, kind: input, shape index: {}]   ;;  %s265_s4 = inlined_call_operand.vmem [shape: f32[2,4,128], index: 4, kind: output, shape index: {0}]   ;;  %s266_s5 = inlined_call_operand.vmem [shape: f32[2,4,128], index: 5, kind: output, shape index: {1}]  }
   0x1   :  { %v19_v2 = vld [vmem:[%s261_s0] sm:$0xf]  ;;  %v24_v8 = vld [vmem:[%s263_s2 + $0x4] sm:$0xf]  ;;  %v225_v18 = vld [vmem:[%s263_s2 + $0x8] sm:$0xf] }
   0x2   :  { %v32_v1 = vshrl.u32 %v31_v0, 7  ;;  %v21_v3 = vld [vmem:[%s262_s1] sm:$0xf]  ;;  %v20_v16 = vld [vmem:[%s261_s0 + $0x4] sm:$0xf] }
   0x3   :  { %v23_v4 = vld [vmem:[%s263_s2] sm:$0xf]  ;;  %v22_v17 = vld [vmem:[%s262_s1 + $0x4] sm:$0xf]  ;;  %v233_v27 = vld [vmem:[%s263_s2 + $0xc] sm:$0xf] }
   0x4   :  { %v33_v5 = vsub.s32 0, %v32_v1  ;;  %v65_v6 = vsub.s32 1, %v32_v1  ;;  %v97_v7 = vsub.s32 2, %v32_v1  ;;  %v27_v9 = vld [vmem:[%s264_s3] sm:$0xf]  ;;  %v129_v10 = vsub.s32 3, %v32_v1 }
   0x5   :  { %v28_v19 = vld [vmem:[%s264_s3 + $0x4] sm:$0xf]  ;;  %v29_v36 = vld [vmem:[%s264_s3 + $0x8] sm:$0xf]  ;;  %v30_v43 = vld [vmem:[%s264_s3 + $0xc] sm:$0xf] }
   0x6   :  { %v34_v11 = vrot.slane %v19_v2, %v33_v5  ;;  %v46_v12 = vrot.slane %v21_v3, %v33_v5  ;;  %v66_v13 = vrot.slane %v19_v2, %v65_v6  ;;  %v78_v14 = vrot.slane %v21_v3, %v65_v6 }
   0x7   :  { %v98_v15 = vrot.slane %v19_v2, %v97_v7  ;;  %v110_v24 = vrot.slane %v21_v3, %v97_v7  ;;  %v130_v25 = vrot.slane %v19_v2, %v129_v10  ;;  %v142_v26 = vrot.slane %v21_v3, %v129_v10 }
   0x8   :  { %v39_v20 = vmul.f32 %v34_v11, %v23_v4  ;;  %v51_v21 = vmul.f32 %v46_v12, %v27_v9  ;;  %v71_v22 = vmul.f32 %v66_v13, %v24_v8  ;;  %v83_v23 = vmul.f32 %v78_v14, %v28_v19 }
   0x9   :  { %v38_v29 = vrot.slane %v20_v16, %v33_v5  ;;  %v50_v30 = vrot.slane %v22_v17, %v33_v5  ;;  %v70_v31 = vrot.slane %v20_v16, %v65_v6  ;;  %v103_v32 = vmul.f32 %v98_v15, %v225_v18 }
   0xa   :  { %v53_v28 = vsub.f32 %v39_v20, %v51_v21  ;;  %v82_v33 = vrot.slane %v22_v17, %v65_v6  ;;  %v102_v34 = vrot.slane %v20_v16, %v97_v7  ;;  %v114_v35 = vrot.slane %v22_v17, %v97_v7 }
   0xb   :  { %v40_v38 = vmul.f32 %v38_v29, %v23_v4  ;;  %v52_v39 = vmul.f32 %v50_v30, %v27_v9  ;;  %v72_v40 = vmul.f32 %v70_v31, %v24_v8  ;;  %v115_v41 = vmul.f32 %v110_v24, %v29_v36 }
   0xc   :  { %v73_v37 = vadd.f32 %v71_v22, %v53_v28  ;;  %v135_v42 = vmul.f32 %v130_v25, %v233_v27  ;;  %v84_v46 = vmul.f32 %v82_v33, %v28_v19  ;;  %v55_v47 = vmul.f32 %v34_v11, %v27_v9 }
   0xd   :  { %v54_v45 = vsub.f32 %v40_v38, %v52_v39  ;;  %v147_v48 = vmul.f32 %v142_v26, %v30_v43  ;;  %v134_v49 = vrot.slane %v20_v16, %v129_v10  ;;  %v59_v50 = vmul.f32 %v46_v12, %v23_v4 }
   0xe   :  { %v85_v44 = vsub.f32 %v73_v37, %v83_v23  ;;  %v87_v51 = vmul.f32 %v66_v13, %v28_v19  ;;  %v104_v54 = vmul.f32 %v102_v34, %v225_v18  ;;  %v116_v55 = vmul.f32 %v114_v35, %v29_v36 }
   0xf   :  { %v74_v53 = vadd.f32 %v72_v40, %v54_v45  ;;  %v146_v56 = vrot.slane %v22_v17, %v129_v10  ;;  %v61_v57 = vadd.f32 %v59_v50, %v55_v47  ;;  %v91_v58 = vmul.f32 %v78_v14, %v24_v8 }
  0x10   :  { %v105_v52 = vadd.f32 %v103_v32, %v85_v44  ;;  %v56_v59 = vmul.f32 %v38_v29, %v27_v9  ;;  %v60_v62 = vmul.f32 %v50_v30, %v23_v4  ;;  %v88_v63 = vmul.f32 %v70_v31, %v28_v19 }
  0x11   :  { %v86_v61 = vsub.f32 %v74_v53, %v84_v46  ;;  %v136_v0 = vmul.f32 %v134_v49, %v233_v27  ;;  %v89_v1 = vadd.f32 %v87_v51, %v61_v57  ;;  %v119_v2 = vmul.f32 %v98_v15, %v29_v36 }
  0x12   :  { %v117_v60 = vsub.f32 %v105_v52, %v115_v41  ;;  %v62_v6 = vadd.f32 %v60_v62, %v56_v59  ;;  %v92_v7 = vmul.f32 %v82_v33, %v24_v8  ;;  %v148_v11 = vmul.f32 %v146_v56, %v30_v43 }
  0x13   :  { %v106_v5 = vadd.f32 %v104_v54, %v86_v61  ;;  %v93_v12 = vadd.f32 %v91_v58, %v89_v1  ;;  %v123_v13 = vmul.f32 %v110_v24, %v225_v18  ;;  %v120_v9 = vmul.f32 %v102_v34, %v29_v36 }
  0x14   :  { %v137_v3 = vadd.f32 %v135_v42, %v117_v60  ;;  %v90_v14 = vadd.f32 %v88_v63, %v62_v6  ;;  %v151_v20 = vmul.f32 %v130_v25, %v30_v43  ;;  %v124_v19 = vmul.f32 %v114_v35, %v225_v18 }
  0x15   :  { %v118_v16 = vsub.f32 %v106_v5, %v116_v55  ;;  %v121_v17 = vadd.f32 %v119_v2, %v93_v12  ;;  %v155_v8 = vmul.f32 %v142_v26, %v233_v27  ;;  %v152_v24 = vmul.f32 %v134_v49, %v30_v43 }
  0x16   :  { %v149_v10 = vsub.f32 %v137_v3, %v147_v48  ;;  %v94_v15 = vadd.f32 %v92_v7, %v90_v14  ;;  %v156_v29 = vmul.f32 %v146_v56, %v233_v27 }
  0x17   :  { %v138_v4 = vadd.f32 %v136_v0, %v118_v16  ;;  %v125_v21 = vadd.f32 %v123_v13, %v121_v17 }
  0x18   :  { %159 = vst [vmem:[%s265_s4] sm:$0xf] %v149_v10  ;;  %v122_v23 = vadd.f32 %v120_v9, %v94_v15 }
  0x19   :  { %v150_v22 = vsub.f32 %v138_v4, %v148_v11  ;;  %v153_v28 = vadd.f32 %v151_v20, %v125_v21 }
  0x1a   :  { %v126_v25 = vadd.f32 %v124_v19, %v122_v23 }
  0x1b   :  { %160 = vst [vmem:[%s265_s4 + $0x4] sm:$0xf] %v150_v22  ;;  %v157_v30 = vadd.f32 %v155_v8, %v153_v28 }
  0x1c   :  { %v154_v31 = vadd.f32 %v152_v24, %v126_v25 }
  0x1d   :  { %161 = vst [vmem:[%s266_s5] sm:$0xf] %v157_v30 }
  0x1e   :  { %v158_v18 = vadd.f32 %v156_v29, %v154_v31 }
  0x20   :  { %162 = vst [vmem:[%s266_s5 + $0x4] sm:$0xf] %v158_v18 }

// kernel: reverse.1
= control target key start
LH: loop header
LB: loop body
LE: loop exit
PB: predicated region body
PF: predicated region fallthrough
CT: control target
= control target key end

     0   :  { %v71_v3 = vlaneseq  ;;  %v64_v9 = vld [vmem:[#allocation0 + $0x7] ss:$-1 sm:$0xff]  ;;  %v78_v12 = vld [vmem:[#allocation0 + $0x17] ss:$-1 sm:$0xff]  ;;  %s329_s0 = inlined_call_operand.vmem [shape: f32[2,4,16,7], index: 0, kind: input, shape index: {}]   ;;  %s330_s1 = inlined_call_operand.vmem [shape: f32[2,4,16,7], index: 1, kind: output, shape index: {}]  }
   0x1   :  { %v44_v0 = vld [vmem:[%s329_s0] sm:$0xff]  ;;  %v46_v1 = vld [vmem:[%s329_s0 + $0x8] sm:$0xff]  ;;  %v48_v2 = vld [vmem:[%s329_s0 + $0x10] sm:$0xff]  ;;  %v65_v10 = vrot.slane %v64_v9, 1  ;;  %v79_v14 = vrot.slane %v78_v12, 1 }
   0x2   :  { %45 = vst [vmem:[#allocation0 + $0x8] sm:$0xff] %v44_v0  ;;  %47 = vst [vmem:[#allocation0 + $0x18] sm:$0xff] %v46_v1  ;;  %v50_v4 = vld [vmem:[%s329_s0 + $0x18] sm:$0xff]  ;;  %v52_v5 = vld [vmem:[%s329_s0 + $0x20] sm:$0xff]  ;;  %v72_v11 = vshrl.u32 %v71_v3, 7 }
   0x3   :  { %49 = vst [vmem:[#allocation0 + $0x28] sm:$0xff] %v48_v2  ;;  %v54_v6 = vld [vmem:[%s329_s0 + $0x28] sm:$0xff]  ;;  %51 = vst [vmem:[#allocation0 + $0x38] sm:$0xff] %v50_v4  ;;  %v56_v7 = vld [vmem:[%s329_s0 + $0x30] sm:$0xff] }
   0x4   :  { %53 = vst [vmem:[#allocation0 + $0x48] sm:$0xff] %v52_v5  ;;  %55 = vst [vmem:[#allocation0 + $0x58] sm:$0xff] %v54_v6  ;;  %v58_v8 = vld [vmem:[%s329_s0 + $0x38] sm:$0xff]  ;;  %v92_v13 = vld [vmem:[#allocation0 + $0x27] ss:$-1 sm:$0xff]  ;;  %vm73_vm0 = vcmp.lt.s32.totalorder %v72_v11, 7 }
   0x5   :  { %57 = vst [vmem:[#allocation0 + $0x68] sm:$0xff] %v56_v7  ;;  %59 = vst [vmem:[#allocation0 + $0x78] sm:$0xff] %v58_v8  ;;  %v93_v15 = vrot.slane %v92_v13, 1  ;;  %v106_v16 = vld [vmem:[#allocation0 + $0x37] ss:$-1 sm:$0xff] }
   0x6   :  { %66 = vst [vmem:[#allocation1] sm:$0xff] %v65_v10  ;;  %v107_v17 = vrot.slane %v106_v16, 1  ;;  %v120_v18 = vld [vmem:[#allocation0 + $0x47] ss:$-1 sm:$0xff]  ;;  %v134_v19 = vld [vmem:[#allocation0 + $0x57] ss:$-1 sm:$0xff] }
   0x7   :  { %80 = vst [vmem:[#allocation1 + $0x8] sm:$0xff] %v79_v14  ;;  %94 = vst [vmem:[#allocation1 + $0x10] sm:$0xff] %v93_v15  ;;  %v121_v20 = vrot.slane %v120_v18, 1  ;;  %v135_v21 = vrot.slane %v134_v19, 1  ;;  %v148_v22 = vld [vmem:[#allocation0 + $0x67] ss:$-1 sm:$0xff] }
   0x8   :  { %v162_v23 = vld [vmem:[#allocation0 + $0x77] ss:$-1 sm:$0xff]  ;;  %108 = vst [vmem:[#allocation1 + $0x18] sm:$0xff] %v107_v17  ;;  %v149_v24 = vrot.slane %v148_v22, 1 }
   0x9   :  { %v163_v25 = vrot.slane %v162_v23, 1  ;;  %v69_v26 = vld [vmem:[#allocation0 + $0xf] ss:$-1 sm:$0xff]  ;;  %v83_v27 = vld [vmem:[#allocation0 + $0x1f] ss:$-1 sm:$0xff]  ;;  %122 = vst [vmem:[#allocation1 + $0x20] sm:$0xff] %v121_v20 }
   0xa   :  { %v97_v28 = vld [vmem:[#allocation0 + $0x2f] ss:$-1 sm:$0xff]  ;;  %136 = vst [vmem:[#allocation1 + $0x28] sm:$0xff] %v135_v21  ;;  %v70_v29 = vrot.slane %v69_v26, 1  ;;  %v84_v30 = vrot.slane %v83_v27, 1  ;;  %150 = vst [vmem:[#allocation1 + $0x30] sm:$0xff] %v149_v24 }
   0xb   :  { %v98_v31 = vrot.slane %v97_v28, 1  ;;  %v111_v32 = vld [vmem:[#allocation0 + $0x3f] ss:$-1 sm:$0xff]  ;;  %164 = vst [vmem:[#allocation1 + $0x38] sm:$0xff] %v163_v25  ;;  %v125_v34 = vld [vmem:[#allocation0 + $0x4f] ss:$-1 sm:$0xff] }
   0xc   :  { %v112_v33 = vrot.slane %v111_v32, 1  ;;  %v139_v35 = vld [vmem:[#allocation0 + $0x5f] ss:$-1 sm:$0xff]  ;;  %74 = vst.msk [vmem:[#allocation1] sm:$0xff] %vm73_vm0, %v70_v29  ;;  %88 = vst.msk [vmem:[#allocation1 + $0x8] sm:$0xff] %vm73_vm0, %v84_v30  ;;  %v126_v36 = vrot.slane %v125_v34, 1 }
   0xd   :  { %102 = vst.msk [vmem:[#allocation1 + $0x10] sm:$0xff] %vm73_vm0, %v98_v31  ;;  %v140_v37 = vrot.slane %v139_v35, 1  ;;  %v153_v38 = vld [vmem:[#allocation0 + $0x6f] ss:$-1 sm:$0xff]  ;;  %v167_v39 = vld [vmem:[#allocation0 + $0x7f] ss:$-1 sm:$0xff] }
   0xe   :  { %116 = vst.msk [vmem:[#allocation1 + $0x18] sm:$0xff] %vm73_vm0, %v112_v33  ;;  %v154_v40 = vrot.slane %v153_v38, 1  ;;  %v168_v41 = vrot.slane %v167_v39, 1  ;;  %130 = vst.msk [vmem:[#allocation1 + $0x20] sm:$0xff] %vm73_vm0, %v126_v36 }
   0xf   :  { %144 = vst.msk [vmem:[#allocation1 + $0x28] sm:$0xff] %vm73_vm0, %v140_v37 }
  0x10   :  { %158 = vst.msk [vmem:[#allocation1 + $0x30] sm:$0xff] %vm73_vm0, %v154_v40  ;;  %172 = vst.msk [vmem:[#allocation1 + $0x38] sm:$0xff] %vm73_vm0, %v168_v41 }
  0x13   :  { %v214_v42 = vld [vmem:[#allocation1] sm:$0xff]  ;;  %v216_v43 = vld [vmem:[#allocation1 + $0x8] sm:$0xff] }
  0x14   :  { %v218_v44 = vld [vmem:[#allocation1 + $0x10] sm:$0xff]  ;;  %215 = vst [vmem:[%s330_s1] sm:$0xff] %v214_v42  ;;  %217 = vst [vmem:[%s330_s1 + $0x8] sm:$0xff] %v216_v43 }
  0x15   :  { %219 = vst [vmem:[%s330_s1 + $0x10] sm:$0xff] %v218_v44  ;;  %v220_v45 = vld [vmem:[#allocation1 + $0x18] sm:$0xff]  ;;  %v222_v46 = vld [vmem:[#allocation1 + $0x20] sm:$0xff] }
  0x16   :  { %221 = vst [vmem:[%s330_s1 + $0x18] sm:$0xff] %v220_v45  ;;  %v224_v47 = vld [vmem:[#allocation1 + $0x28] sm:$0xff]  ;;  %223 = vst [vmem:[%s330_s1 + $0x20] sm:$0xff] %v222_v46 }
  0x17   :  { %225 = vst [vmem:[%s330_s1 + $0x28] sm:$0xff] %v224_v47  ;;  %v226_v48 = vld [vmem:[#allocation1 + $0x30] sm:$0xff]  ;;  %v228_v49 = vld [vmem:[#allocation1 + $0x38] sm:$0xff] }
  0x18   :  { %227 = vst [vmem:[%s330_s1 + $0x30] sm:$0xff] %v226_v48  ;;  %229 = vst [vmem:[%s330_s1 + $0x38] sm:$0xff] %v228_v49 }

</bundles_post_ra>
